<compile_context>
chip_gen: v5e
topology: v5e:2x2
jax: 0.10.0
libtpu: 0.0.40
codegen_flags: <defaults>
</compile_context>

<pallas_src>
import jax
import jax.numpy as jnp
from jax.experimental import pallas as pl
from jax.experimental.pallas import tpu as pltpu


def _segment_loss_kernel(xt_ref, x_ref, out_ref):
    # xt_ref:  [C, TB]  transposed tile (class rows on sublanes, batch on lanes)
    # x_ref:   [B, C]   original layout, block index constant across the grid (resident)
    # out_ref: [B, TB]  lane-dense tile of the [B, B] result
    f32 = jnp.float32

    # log-softmax of the 4 alpha classes, lane-dense over batch (pure VPU / EUP work).
    r0 = xt_ref[0:1, :].astype(f32)
    r1 = xt_ref[1:2, :].astype(f32)
    r2 = xt_ref[2:3, :].astype(f32)
    r3 = xt_ref[3:4, :].astype(f32)
    m = jnp.maximum(jnp.maximum(r0, r1), jnp.maximum(r2, r3))
    sumexp = jnp.exp(r0 - m) + jnp.exp(r1 - m) + jnp.exp(r2 - m) + jnp.exp(r3 - m)
    lse = m + jnp.log(sumexp)                       # [1, TB]
    s_row = r0 + r1 - 2.0 * lse                     # sa[:, 0] + sa[:, 1]  -> [1, TB]

    # log-sigmoid of the segmentation logit as a [B, 1] column (sublane axis).
    seg_logit = x_ref[:, 4:5].astype(f32)           # [B, 1]
    seg_col = jnp.minimum(seg_logit, 0.0) - jnp.log1p(jnp.exp(-jnp.abs(seg_logit)))

    # |s[j] - seg[i]|  ==  torch.abs(sa[:,0] + sa[:,1] - seg) with torch broadcasting.
    out_ref[...] = jnp.abs(s_row - seg_col).astype(out_ref.dtype)


def segment_loss(alpha_logits, *, block_b=None):
    """Pallas TPU implementation of segment_loss_.forward.

    alpha_logits: [B, 5] (4 alpha-class logits + 1 segmentation logit).
    Returns abs(log_softmax(alpha[:, :4])[:, 0] + [:, 1] - log_sigmoid(alpha[:, 4:]))
    with exact torch broadcasting semantics ([B] vs [B, 1] -> [B, B]).
    """
    B, C = alpha_logits.shape
    assert C == 5, "kernel specialized to 4 alpha classes + 1 segment logit"
    # TODO(synk): alpha_logits[:, 4:] wider than one column (C > 5) is not implemented.

    if block_b is None:
        block_b = B if B <= 1024 else 512
    if block_b != B:
        assert B % block_b == 0 and block_b % 128 == 0, (
            "lane tile must be a multiple of 128 or the full batch")

    xt = alpha_logits.T                              # [C, B] layout plumbing (batch on lanes)

    grid_spec = pltpu.PrefetchScalarGridSpec(
        num_scalar_prefetch=0,
        grid=(B // block_b,),
        in_specs=[
            pl.BlockSpec((C, block_b), lambda j: (0, j)),   # transposed view, lane-tiled
            pl.BlockSpec((B, C), lambda j: (0, 0)),         # original layout, resident
        ],
        out_specs=pl.BlockSpec((B, block_b), lambda j: (0, j)),
    )

    out = pl.pallas_call(
        _segment_loss_kernel,
        grid_spec=grid_spec,
        out_shape=jax.ShapeDtypeStruct((B, B), alpha_logits.dtype),
        compiler_params=pltpu.CompilerParams(
            dimension_semantics=("parallel",)),
    )(xt, alpha_logits)
    return out


def _reference(alpha_logits):
    sa = jax.nn.log_softmax(alpha_logits[:, 0:4], axis=1)
    seg = jax.nn.log_sigmoid(alpha_logits[:, 4:])
    return jnp.abs(sa[:, 0] + sa[:, 1] - seg)       # numpy broadcasting == torch broadcasting here


if __name__ == "__main__":
    key = jax.random.PRNGKey(0)
    B, C = 8, 5
    alpha_logits = jax.random.normal(key, (B, C), dtype=jnp.float32)

    out = segment_loss(alpha_logits)
    jax.block_until_ready(out)

    ref = _reference(alpha_logits)
    assert out.shape == ref.shape, (out.shape, ref.shape)
    assert out.dtype == ref.dtype, (out.dtype, ref.dtype)
    assert jnp.allclose(out, ref, rtol=1e-5, atol=1e-5), (out, ref)

    print("KERNEL_OK")
</pallas_src>

<mosaic_0001>
module attributes {stable_mosaic.version = 11 : i64} {
  func.func @_segment_loss_kernel(%arg0: i32, %arg1: memref<5x8xf32, #tpu.memory_space<vmem>>, %arg2: memref<8x5xf32, #tpu.memory_space<vmem>>, %arg3: memref<8x8xf32, #tpu.memory_space<vmem>>) attributes {dimension_semantics = [#tpu.dimension_semantics<parallel>], iteration_bounds = array<i64: 1>, scalar_prefetch = 0 : i64, scratch_operands = 0 : i64, tpu.core_type = #tpu.core_type<tc>, window_params = [{transform_indices = @transform_0, window_bounds = array<i64: 5, 8>}, {pipeline_mode = #tpu.pipeline_mode<synchronous>, transform_indices = @transform_1, window_bounds = array<i64: 8, 5>}, {transform_indices = @transform_2, window_bounds = array<i64: 8, 8>}]} {
    %c0 = arith.constant 0 : index
    %c0_0 = arith.constant 0 : index
    %0 = vector.load %arg1[%c0, %c0_0] : memref<5x8xf32, #tpu.memory_space<vmem>>, vector<1x8xf32>
    %c1 = arith.constant 1 : index
    %c0_1 = arith.constant 0 : index
    %1 = vector.load %arg1[%c1, %c0_1] : memref<5x8xf32, #tpu.memory_space<vmem>>, vector<1x8xf32>
    %c2 = arith.constant 2 : index
    %c0_2 = arith.constant 0 : index
    %2 = vector.load %arg1[%c2, %c0_2] : memref<5x8xf32, #tpu.memory_space<vmem>>, vector<1x8xf32>
    %c3 = arith.constant 3 : index
    %c0_3 = arith.constant 0 : index
    %3 = vector.load %arg1[%c3, %c0_3] : memref<5x8xf32, #tpu.memory_space<vmem>>, vector<1x8xf32>
    %4 = arith.maximumf %0, %1 : vector<1x8xf32>
    %5 = arith.maximumf %2, %3 : vector<1x8xf32>
    %6 = arith.maximumf %4, %5 : vector<1x8xf32>
    %7 = arith.subf %0, %6 : vector<1x8xf32>
    %8 = math.exp %7 : vector<1x8xf32>
    %9 = arith.subf %1, %6 : vector<1x8xf32>
    %10 = math.exp %9 : vector<1x8xf32>
    %11 = arith.addf %8, %10 : vector<1x8xf32>
    %12 = arith.subf %2, %6 : vector<1x8xf32>
    %13 = math.exp %12 : vector<1x8xf32>
    %14 = arith.addf %11, %13 : vector<1x8xf32>
    %15 = arith.subf %3, %6 : vector<1x8xf32>
    %16 = math.exp %15 : vector<1x8xf32>
    %17 = arith.addf %14, %16 : vector<1x8xf32>
    %18 = math.log %17 : vector<1x8xf32>
    %19 = arith.addf %6, %18 : vector<1x8xf32>
    %20 = arith.addf %0, %1 : vector<1x8xf32>
    %cst = arith.constant 2.000000e+00 : f32
    %21 = vector.broadcast %cst : f32 to vector<1x8xf32>
    %22 = arith.mulf %21, %19 : vector<1x8xf32>
    %23 = arith.subf %20, %22 : vector<1x8xf32>
    %c0_4 = arith.constant 0 : index
    %c4 = arith.constant 4 : index
    %24 = vector.load %arg2[%c0_4, %c4] : memref<8x5xf32, #tpu.memory_space<vmem>>, vector<8x1xf32>
    %cst_5 = arith.constant 0.000000e+00 : f32
    %25 = vector.broadcast %cst_5 : f32 to vector<8x1xf32>
    %26 = arith.minimumf %24, %25 : vector<8x1xf32>
    %27 = math.absf %24 : vector<8x1xf32>
    %cst_6 = arith.constant 0.000000e+00 : f32
    %28 = vector.broadcast %cst_6 : f32 to vector<8x1xf32>
    %29 = arith.subf %28, %27 : vector<8x1xf32>
    %30 = math.exp %29 : vector<8x1xf32>
    %31 = math.log1p %30 : vector<8x1xf32>
    %32 = arith.subf %26, %31 : vector<8x1xf32>
    %33 = vector.broadcast %23 : vector<1x8xf32> to vector<8x8xf32>
    %34 = vector.broadcast %32 : vector<8x1xf32> to vector<8x8xf32>
    %35 = arith.subf %33, %34 : vector<8x8xf32>
    %36 = math.absf %35 : vector<8x8xf32>
    %c0_7 = arith.constant 0 : index
    %c0_8 = arith.constant 0 : index
    %37 = vector.load %arg3[%c0_7, %c0_8] : memref<8x8xf32, #tpu.memory_space<vmem>>, vector<8x8xf32>
    tpu.vector_store %arg3[%c0_7, %c0_8], %36 {strides = array<i32>} : memref<8x8xf32, #tpu.memory_space<vmem>>, vector<8x8xf32>,
    return
  }
  func.func @transform_0(%arg0: i32) -> (i32, i32) {
    %c0_i32 = arith.constant 0 : i32
    %c0_i32_0 = arith.constant 0 : i32
    return %c0_i32, %arg0 : i32, i32
  }
  func.func @transform_1(%arg0: i32) -> (i32, i32) {
    %c0_i32 = arith.constant 0 : i32
    %c0_i32_0 = arith.constant 0 : i32
    %c0_i32_1 = arith.constant 0 : i32
    return %c0_i32, %c0_i32_0 : i32, i32
  }
  func.func @transform_2(%arg0: i32) -> (i32, i32) {
    %c0_i32 = arith.constant 0 : i32
    %c0_i32_0 = arith.constant 0 : i32
    return %c0_i32, %arg0 : i32, i32
  }
}

</mosaic_0001>

<bundles_post_ra>
// kernel: tpu_custom_call.1
= control target key start
LH: loop header
LB: loop body
LE: loop exit
PB: predicated region body
PF: predicated region fallthrough
CT: control target
= control target key end

     0   :  { %7 = vsyncpa [#allocation3], 0  ;;  %s237_s0 = inlined_call_operand.hbm [shape: f32[5,8], index: 0, kind: input, shape index: {}]   ;;  %s238_s1 = inlined_call_operand.hbm [shape: f32[8,5], index: 1, kind: input, shape index: {}]   ;;  %s239_s2 = inlined_call_operand.hbm [shape: f32[8,8], index: 2, kind: output, shape index: {}]  }
   0x1   :  { %8 = vsyncpa [#allocation6], 0 }
   0x2   :  { %9 = vsyncpa [#allocation4], 0  ;;  %s15_s11 = sshll.u32 %s237_s0, 4  ;;  %s209_s12 = smov [#allocation2]   ;;  %s16_s11 = int_to_ptr.hbm [resolvable:$true] %s15_s11 }
   0x3   :  { %s17_s13 = sshll.u32 %s209_s12, 4  ;;  %s26_s16 = sshll.u32 %s238_s1, 4  ;;  %s18_s13 = int_to_ptr.vmem [resolvable:$true] %s17_s13  ;;  %s27_s16 = int_to_ptr.hbm [resolvable:$true] %s26_s16 }
   0x4   :  { %20 = dma.hbm_to_vmem [thread:$0]  %s16_s11, 128, %s18_s13, [#allocation3]  }
   0x5   :  { %s210_s17 = smov [#allocation5]  }
   0x6   :  { %s28_s18 = sshll.u32 %s210_s17, 4  ;;  %s29_s18 = int_to_ptr.vmem [resolvable:$true] %s28_s18 }
   0x7   :  { %31 = dma.hbm_to_vmem [thread:$0]  %s27_s16, 128, %s29_s18, [#allocation6]  }
   0x8   :  { %203 = dma.done.wait [#allocation3], 128  }
   0x9   :  { %204 = vsyncadd [#allocation3], 4294967168 }
   0xa   :  { %205 = dma.done.wait [#allocation6], 128  }
   0xb   :  { %206 = vsyncadd [#allocation6], 4294967168  ;;  %v211_v0 = vmov 4   ;;  %v68_v1 = vld [vmem:[#allocation5] sm:$0xff]  ;;  %v40_v16 = vld [vmem:[#allocation2] sm:$0x1] }
   0xc   :  { %116 = vset.pattern.permute.xlu0 %v211_v0  ;;  %v70_v2 = vand.u32 2147483647, %v68_v1  ;;  %v69_v12 = vmin.f32 %v68_v1, 0.0  ;;  %v41_v17 = vld [vmem:[#allocation2 + $0x1] sm:$0x1]  ;;  %s212_s0 = smov [#allocation7]  }
   0xd   :  { %v42_v18 = vld [vmem:[#allocation2 + $0x2] sm:$0x1]  ;;  %v43_v19 = vld [vmem:[#allocation2 + $0x3] sm:$0x1]  ;;  %v44_v20 = vmax.f32 %v40_v16, %v41_v17  ;;  %v65_v41 = vadd.f32 %v41_v17, %v40_v16  ;;  %s99_s1 = sshll.u32 %s212_s0, 4  ;;  %s101_s21 = sshll.u32 %s239_s2, 4  ;;  %s100_s1 = int_to_ptr.vmem [resolvable:$true] %s99_s1  ;;  %s102_s21 = int_to_ptr.hbm [resolvable:$true] %s101_s21 }
   0xe   :  { %v71_v3 = vsub.f32 0.0, %v70_v2  ;;  %v45_v21 = vmax.f32 %v42_v18, %v43_v19  ;;  %vm92_vm1 = vcmask 64512  }
  0x10   :  { %v72_v4 = vmul.f32 1.442695, %v71_v3  ;;  %v46_v22 = vmax.f32 %v44_v20, %v45_v21 }
  0x12   :  { %117 = vpow2.f32 %v72_v4  ;;  %v47_v23 = vsub.f32 %v40_v16, %v46_v22  ;;  %v50_v24 = vsub.f32 %v41_v17, %v46_v22  ;;  %v54_v27 = vsub.f32 %v42_v18, %v46_v22 }
  0x13   :  { %v58_v29 = vsub.f32 %v43_v19, %v46_v22 }
  0x14   :  { %v48_v25 = vmul.f32 1.442695, %v47_v23  ;;  %v51_v26 = vmul.f32 1.442695, %v50_v24  ;;  %v55_v28 = vmul.f32 1.442695, %v54_v27 }
  0x15   :  { %v59_v30 = vmul.f32 1.442695, %v58_v29 }
  0x18   :  { %v118_v5 = vpop.eup %117 }
  0x19   :  { %v74_v6 = vadd.f32 1.0, %v118_v5  ;;  %v77_v7 = vmul.f32 -0.5, %v118_v5  ;;  %v80_v9 = vand.u32 2147483647, %v118_v5 }
  0x1b   :  { %119 = vlog2.f32 %v74_v6  ;;  %v78_v8 = vadd.f32 1.0, %v77_v7  ;;  %vm81_vm0 = vcmp.lt.f32.partialorder %v80_v9, 0.0004427343 }
  0x1c   :  { %121 = vpow2.f32 %v48_v25 }
  0x1d   :  { %v79_v10 = vmul.f32 %v118_v5, %v78_v8  ;;  %123 = vpow2.f32 %v51_v26 }
  0x1e   :  { %125 = vpow2.f32 %v55_v28 }
  0x1f   :  { %127 = vpow2.f32 %v59_v30 }
  0x21   :  { %v120_v11 = vpop.eup %119 }
  0x22   :  { %v76_v13 = vmul.f32 0.6931472, %v120_v11  ;;  %v122_v31 = vpop.eup %121 }
  0x23   :  { %v124_v32 = vpop.eup %123 }
  0x24   :  { %v82_v14 = vsel %vm81_vm0, %v79_v10, %v76_v13  ;;  %v53_v33 = vadd.f32 %v124_v32, %v122_v31  ;;  %v126_v34 = vpop.eup %125 }
  0x25   :  { %v83_v15 = vsub.f32 %v69_v12, %v82_v14  ;;  %v128_v36 = vpop.eup %127 }
  0x26   :  { %v57_v35 = vadd.f32 %v126_v34, %v53_v33 }
  0x27   :  { %87 = vperm.xlu0 %116, %v83_v15  }
  0x28   :  { %v61_v37 = vadd.f32 %v128_v36, %v57_v35 }
  0x2a   :  { %129 = vlog2.f32 %v61_v37 }
  0x30   :  { %v130_v38 = vpop.eup %129 }
  0x31   :  { %v63_v39 = vmul.f32 0.6931472, %v130_v38 }
  0x33   :  { %v64_v40 = vadd.f32 %v63_v39, %v46_v22 }
  0x35   :  { %v66_v42 = vmul.f32 2.0, %v64_v40 }
  0x37   :  { %v67_v43 = vsub.f32 %v65_v41, %v66_v42 }
  0x39   :  { %v84_v44 = vperm.slane %v67_v43, 0 }
  0x99   :  { %v88_v45 = vpop.permute.xlu0 %87 }
  0x9a   :  { %v90_v46 = vsub.f32 %v84_v44, %v88_v45 }
  0x9c   :  { %v91_v47 = vand.u32 2147483647, %v90_v46 }
  0x9e   :  { %93 = vst.msk [vmem:[#allocation7] sm:$0xff] %vm92_vm1, %v91_v47 }
  0x9f   :  { %104 = dma.vmem_to_hbm [thread:$0]  %s100_s1, 128, %s102_s21, [#allocation4]  }
  0xa0   :  { %207 = dma.done.wait [#allocation4], 128  }
  0xa1   :  { %208 = vsyncadd [#allocation4], 4294967168 }
  0xa2   :  { %109 = vsyncpa [#allocation3], 1 }
  0xa3   :  { %110 = vsyncpa [#allocation6], 1 }
  0xa4   :  { %111 = vsyncpa [#allocation4], 1 }

</bundles_post_ra>
